<compile_context>
chip_gen: v5e
topology: v5e:2x2
jax: 0.10.0
libtpu: 0.0.40
codegen_flags: <defaults>
</compile_context>

<pallas_src>
import math

import jax
import jax.numpy as jnp
from jax.experimental import pallas as pl
from jax.experimental.pallas import tpu as pltpu


_VMEM_TILE_BUDGET_BYTES = 20 * 1024 * 1024   # budget for streamed tiles + temporaries
_VMEM_LIMIT_BYTES = 30 * 1024 * 1024         # explicit scoped-VMEM limit (safe v5e/v6e/v7x)


def _make_timesiren_kernel(in_dim, use_vpu_lin1):
    """Kernel factory: `in_dim` / `use_vpu_lin1` are static (closure)."""

    def kernel(x_ref, w1_ref, w2_ref, b2_ref, o_ref):
        if use_vpu_lin1:
            # lin1 on the VPU: in_dim broadcast-FMAs.  Avoids wasting a full
            # 256-wide MXU pass on a K=4 contraction (matters most on v7x).
            x = x_ref[...].astype(jnp.float32)        # (TM, in_dim)
            w1 = w1_ref[...].astype(jnp.float32)      # (in_dim, emb)
            h = x[:, 0:1] * w1[0:1, :]
            for k in range(1, in_dim):
                h = h + x[:, k:k + 1] * w1[k:k + 1, :]
        else:
            # lin1 on the MXU (bf16 operands, f32 accumulation).
            h = jnp.dot(x_ref[...], w1_ref[...],
                        preferred_element_type=jnp.float32)

        # Siren activation in f32.
        h = jnp.sin(h)

        # lin2 (+ bias): cast activation back to the weight dtype so the MXU
        # keeps its fast bf16 path; accumulate in f32, bias-add in f32.
        h = jnp.dot(h.astype(w2_ref.dtype), w2_ref[...],
                    preferred_element_type=jnp.float32)
        h = h + b2_ref[...].astype(jnp.float32)
        o_ref[...] = h.astype(o_ref.dtype)

    return kernel


def init_time_siren_params(key, input_dim, emb_dim, dtype=jnp.bfloat16):
    """Deterministic init mimicking nn.Linear defaults: U(-1/sqrt(fan_in), +).
    Weights stored transposed, (in, out), so the kernel computes x @ W + b."""
    k1, k2, k3 = jax.random.split(key, 3)
    b1 = 1.0 / math.sqrt(input_dim)
    b2 = 1.0 / math.sqrt(emb_dim)
    w1 = jax.random.uniform(k1, (input_dim, emb_dim), jnp.float32, -b1, b1).astype(dtype)
    w2 = jax.random.uniform(k2, (emb_dim, emb_dim), jnp.float32, -b2, b2).astype(dtype)
    bias2 = jax.random.uniform(k3, (1, emb_dim), jnp.float32, -b2, b2).astype(dtype)
    return w1, w2, bias2


def _round_up(x, m):
    return (x + m - 1) // m * m


def _pick_token_tile(n_tokens, in_dim, emb_dim, dtype_bytes):
    """Largest token tile (multiple of 16 sublane rows — covers bf16 packing)
    that fits the VMEM tile budget, with corrected accounting:
      - the (TM, in_dim) x tile is lane-padded to a multiple of 128 in VMEM,
      - ~3 live (TM, emb_dim) f32 temporaries (post-dot1 / post-sin / post-dot2),
      - resident weights counted 2x (double-buffer worst case)."""
    in_lanes = _round_up(in_dim, 128)
    out_lanes = _round_up(emb_dim, 128)

    weight_bytes = 2 * ((_round_up(in_dim, 16) * out_lanes
                         + _round_up(emb_dim, 16) * out_lanes
                         + 16 * out_lanes) * dtype_bytes)
    avail = max(_VMEM_TILE_BUDGET_BYTES - weight_bytes, 1 << 20)

    per_row = (2 * in_lanes * dtype_bytes      # 2x-buffered x tile (lane padded)
               + 2 * out_lanes * dtype_bytes   # 2x-buffered out tile
               + 3 * out_lanes * 4)            # live f32 temporaries
    tm = int(avail // per_row)

    # Keep >=2 grid steps so the "parallel" axis can shard across v7x's 2 TCs.
    two_step_cap = max(16, _round_up(-(-n_tokens // 2), 16))

    tm = min(tm, 4096, two_step_cap)
    tm = max(16, (tm // 16) * 16)
    return tm


def time_siren_forward(x, params):
    """TimeSiren forward: sin(x @ W1) @ W2 + b2, tiled over the token axis."""
    w1, w2, b2 = params
    in_dim = x.shape[-1]
    emb_dim = w2.shape[-1]
    lead = x.shape[:-1]

    x2d = x.reshape(-1, in_dim)
    n_tokens = x2d.shape[0]
    dtype_bytes = jnp.dtype(x.dtype).itemsize

    tm = _pick_token_tile(n_tokens, in_dim, emb_dim, dtype_bytes)
    grid = (pl.cdiv(n_tokens, tm),)   # ragged last block handled by Pallas

    use_vpu_lin1 = in_dim <= 8
    kernel = _make_timesiren_kernel(in_dim, use_vpu_lin1)

    flops = 2 * n_tokens * (in_dim * emb_dim + emb_dim * emb_dim)
    bytes_accessed = (n_tokens * in_dim                                   # streamed input
                      + in_dim * emb_dim + emb_dim * emb_dim + emb_dim   # weights
                      + n_tokens * emb_dim) * dtype_bytes                # output

    out2d = pl.pallas_call(
        kernel,
        out_shape=jax.ShapeDtypeStruct((n_tokens, emb_dim), x.dtype),
        grid=grid,
        in_specs=[
            pl.BlockSpec((tm, in_dim), lambda i: (i, 0)),        # x: streamed tiles
            pl.BlockSpec((in_dim, emb_dim), lambda i: (0, 0)),   # W1: VMEM-resident
            pl.BlockSpec((emb_dim, emb_dim), lambda i: (0, 0)),  # W2: VMEM-resident
            pl.BlockSpec((1, emb_dim), lambda i: (0, 0)),        # b2: VMEM-resident
        ],
        out_specs=pl.BlockSpec((tm, emb_dim), lambda i: (i, 0)),
        compiler_params=pltpu.CompilerParams(
            dimension_semantics=("parallel",),           # megacore sharding on v7x
            vmem_limit_bytes=_VMEM_LIMIT_BYTES),         # v5e default scope is 16 MiB
        cost_estimate=pl.CostEstimate(
            flops=flops,
            transcendentals=n_tokens * emb_dim,          # sin()
            bytes_accessed=bytes_accessed),
    )(x2d, w1, w2, b2)

    return out2d.reshape(*lead, emb_dim)


def _reference_forward(x, params):
    """Pure-JAX reference (same math / same precision policy as the kernel)."""
    w1, w2, b2 = params
    h = jnp.dot(x.astype(jnp.float32), w1.astype(jnp.float32))
    h = jnp.sin(h)
    h = jnp.dot(h.astype(w2.dtype), w2, preferred_element_type=jnp.float32)
    h = h + b2.astype(jnp.float32)
    return h.astype(x.dtype)


if __name__ == "__main__":
    # Small shapes consistent with TimeSiren as a time-embedding MLP:
    # batch=2, seq=8, input_dim=4, emb_dim=128 (lane-dense output).
    input_dim, emb_dim = 4, 128
    batch, seq = 2, 8
    dtype = jnp.bfloat16

    key = jax.random.PRNGKey(0)
    key, kx = jax.random.split(key)
    x = jax.random.normal(kx, (batch, seq, input_dim), dtype=jnp.float32).astype(dtype)

    params = init_time_siren_params(key, input_dim, emb_dim, dtype=dtype)

    y = time_siren_forward(x, params)
    y = jax.block_until_ready(y)

    y_ref = _reference_forward(x.reshape(-1, input_dim), params).reshape(y.shape)
    assert y.shape == (batch, seq, emb_dim)
    assert jnp.allclose(y.astype(jnp.float32), y_ref.astype(jnp.float32),
                        atol=2e-2, rtol=2e-2), "mismatch vs reference"

    print("KERNEL_OK")
</pallas_src>

<mosaic_0001>
module attributes {stable_mosaic.version = 11 : i64} {
  func.func @kernel(%arg0: i32, %arg1: memref<16x4xbf16, #tpu.memory_space<vmem>>, %arg2: memref<4x128xbf16, #tpu.memory_space<vmem>>, %arg3: memref<128x128xbf16, #tpu.memory_space<vmem>>, %arg4: memref<1x128xbf16, #tpu.memory_space<vmem>>, %arg5: memref<16x128xbf16, #tpu.memory_space<vmem>>) attributes {dimension_semantics = [#tpu.dimension_semantics<parallel>], iteration_bounds = array<i64: 1>, scalar_prefetch = 0 : i64, scratch_operands = 0 : i64, tpu.core_type = #tpu.core_type<tc>, window_params = [{transform_indices = @transform_0, window_bounds = array<i64: 16, 4>}, {pipeline_mode = #tpu.pipeline_mode<synchronous>, transform_indices = @transform_1, window_bounds = array<i64: 4, 128>}, {pipeline_mode = #tpu.pipeline_mode<synchronous>, transform_indices = @transform_2, window_bounds = array<i64: 128, 128>}, {pipeline_mode = #tpu.pipeline_mode<synchronous>, transform_indices = @transform_3, window_bounds = array<i64: 1, 128>}, {transform_indices = @transform_4, window_bounds = array<i64: 16, 128>}]} {
    %c0 = arith.constant 0 : index
    %c0_0 = arith.constant 0 : index
    %0 = vector.load %arg1[%c0, %c0_0] : memref<16x4xbf16, #tpu.memory_space<vmem>>, vector<16x4xbf16>
    %1 = arith.extf %0 : vector<16x4xbf16> to vector<16x4xf32>
    %c0_1 = arith.constant 0 : index
    %c0_2 = arith.constant 0 : index
    %2 = vector.load %arg2[%c0_1, %c0_2] : memref<4x128xbf16, #tpu.memory_space<vmem>>, vector<4x128xbf16>
    %3 = arith.extf %2 : vector<4x128xbf16> to vector<4x128xf32>
    %4 = vector.extract_strided_slice %1 {offsets = [0, 0], sizes = [16, 1], strides = [1, 1]} : vector<16x4xf32> to vector<16x1xf32>
    %5 = vector.extract_strided_slice %3 {offsets = [0, 0], sizes = [1, 128], strides = [1, 1]} : vector<4x128xf32> to vector<1x128xf32>
    %6 = vector.broadcast %4 : vector<16x1xf32> to vector<16x128xf32>
    %7 = vector.broadcast %5 : vector<1x128xf32> to vector<16x128xf32>
    %8 = arith.mulf %6, %7 : vector<16x128xf32>
    %9 = vector.extract_strided_slice %1 {offsets = [0, 1], sizes = [16, 1], strides = [1, 1]} : vector<16x4xf32> to vector<16x1xf32>
    %10 = vector.extract_strided_slice %3 {offsets = [1, 0], sizes = [1, 128], strides = [1, 1]} : vector<4x128xf32> to vector<1x128xf32>
    %11 = vector.broadcast %9 : vector<16x1xf32> to vector<16x128xf32>
    %12 = vector.broadcast %10 : vector<1x128xf32> to vector<16x128xf32>
    %13 = arith.mulf %11, %12 : vector<16x128xf32>
    %14 = arith.addf %8, %13 : vector<16x128xf32>
    %15 = vector.extract_strided_slice %1 {offsets = [0, 2], sizes = [16, 1], strides = [1, 1]} : vector<16x4xf32> to vector<16x1xf32>
    %16 = vector.extract_strided_slice %3 {offsets = [2, 0], sizes = [1, 128], strides = [1, 1]} : vector<4x128xf32> to vector<1x128xf32>
    %17 = vector.broadcast %15 : vector<16x1xf32> to vector<16x128xf32>
    %18 = vector.broadcast %16 : vector<1x128xf32> to vector<16x128xf32>
    %19 = arith.mulf %17, %18 : vector<16x128xf32>
    %20 = arith.addf %14, %19 : vector<16x128xf32>
    %21 = vector.extract_strided_slice %1 {offsets = [0, 3], sizes = [16, 1], strides = [1, 1]} : vector<16x4xf32> to vector<16x1xf32>
    %22 = vector.extract_strided_slice %3 {offsets = [3, 0], sizes = [1, 128], strides = [1, 1]} : vector<4x128xf32> to vector<1x128xf32>
    %23 = vector.broadcast %21 : vector<16x1xf32> to vector<16x128xf32>
    %24 = vector.broadcast %22 : vector<1x128xf32> to vector<16x128xf32>
    %25 = arith.mulf %23, %24 : vector<16x128xf32>
    %26 = arith.addf %20, %25 : vector<16x128xf32>
    %27 = math.sin %26 : vector<16x128xf32>
    %28 = arith.truncf %27 : vector<16x128xf32> to vector<16x128xbf16>
    %c0_3 = arith.constant 0 : index
    %c0_4 = arith.constant 0 : index
    %29 = vector.load %arg3[%c0_3, %c0_4] : memref<128x128xbf16, #tpu.memory_space<vmem>>, vector<128x128xbf16>
    %cst = arith.constant dense<0.000000e+00> : vector<16x128xf32>
    %30 = tpu.matmul %28, %29, %cst {dimension_numbers = #tpu.dot_dimension_numbers<[1], [0], [0], [1], [0, 0, 1, 1], [], []>} : vector<16x128xbf16>, vector<128x128xbf16>, vector<16x128xf32> -> vector<16x128xf32>
    %c0_5 = arith.constant 0 : index
    %c0_6 = arith.constant 0 : index
    %31 = vector.load %arg4[%c0_5, %c0_6] : memref<1x128xbf16, #tpu.memory_space<vmem>>, vector<1x128xbf16>
    %32 = arith.extf %31 : vector<1x128xbf16> to vector<1x128xf32>
    %33 = vector.broadcast %32 : vector<1x128xf32> to vector<16x128xf32>
    %34 = arith.addf %30, %33 : vector<16x128xf32>
    %35 = arith.truncf %34 : vector<16x128xf32> to vector<16x128xbf16>
    %c0_7 = arith.constant 0 : index
    %c0_8 = arith.constant 0 : index
    %36 = vector.load %arg5[%c0_7, %c0_8] : memref<16x128xbf16, #tpu.memory_space<vmem>>, vector<16x128xbf16>
    tpu.vector_store %arg5[%c0_7, %c0_8], %35 {strides = array<i32>} : memref<16x128xbf16, #tpu.memory_space<vmem>>, vector<16x128xbf16>,
    return
  }
  func.func @transform_0(%arg0: i32) -> (i32, i32) {
    %c0_i32 = arith.constant 0 : i32
    %c0_i32_0 = arith.constant 0 : i32
    return %arg0, %c0_i32 : i32, i32
  }
  func.func @transform_1(%arg0: i32) -> (i32, i32) {
    %c0_i32 = arith.constant 0 : i32
    %c0_i32_0 = arith.constant 0 : i32
    %c0_i32_1 = arith.constant 0 : i32
    return %c0_i32, %c0_i32_0 : i32, i32
  }
  func.func @transform_2(%arg0: i32) -> (i32, i32) {
    %c0_i32 = arith.constant 0 : i32
    %c0_i32_0 = arith.constant 0 : i32
    %c0_i32_1 = arith.constant 0 : i32
    return %c0_i32, %c0_i32_0 : i32, i32
  }
  func.func @transform_3(%arg0: i32) -> (i32, i32) {
    %c0_i32 = arith.constant 0 : i32
    %c0_i32_0 = arith.constant 0 : i32
    %c0_i32_1 = arith.constant 0 : i32
    return %c0_i32, %c0_i32_0 : i32, i32
  }
  func.func @transform_4(%arg0: i32) -> (i32, i32) {
    %c0_i32 = arith.constant 0 : i32
    %c0_i32_0 = arith.constant 0 : i32
    return %arg0, %c0_i32 : i32, i32
  }
}

</mosaic_0001>

<bundles_post_ra>
// kernel: tpu_custom_call.1
= control target key start
LH: loop header
LB: loop body
LE: loop exit
PB: predicated region body
PF: predicated region fallthrough
CT: control target
= control target key end

     0   :  { %9 = vsyncpa [#allocation3], 0  ;;  %s878_s0 = inlined_call_operand.vmem [shape: bf16[16,4], index: 0, kind: input, shape index: {}]   ;;  %s879_s1 = inlined_call_operand.vmem [shape: bf16[4,128], index: 1, kind: input, shape index: {}]   ;;  %s880_s2 = inlined_call_operand.hbm [shape: bf16[128,128], index: 2, kind: input, shape index: {}]   ;;  %s881_s3 = inlined_call_operand.vmem [shape: bf16[1,128], index: 3, kind: input, shape index: {}]   ;;  %s882_s4 = inlined_call_operand.hbm [shape: bf16[16,128], index: 4, kind: output, shape index: {}]  }
   0x1   :  { %10 = vsyncpa [#allocation4], 0  ;;  %s19_s17 = sshll.u32 %s880_s2, 4  ;;  %s653_s18 = smov [#allocation2]   ;;  %s20_s17 = int_to_ptr.hbm [resolvable:$true] %s19_s17 }
   0x2   :  { %s21_s19 = sshll.u32 %s653_s18, 4  ;;  %s654_s20 = smov 64   ;;  %s22_s19 = int_to_ptr.vmem [resolvable:$true] %s21_s19 }
   0x3   :  { %s655_s21 = smov 4  }
   0x4   :  { %27 = dma.hbm_to_vmem [thread:$0]  %s20_s17, 1024, %s22_s19, [#allocation3], %s654_s20, %s654_s20, %s655_s21  }
   0x5   :  { %649 = dma.done.wait [#allocation3], 1024  }
   0x6   :  { %650 = vsyncadd [#allocation3], 4294966272  ;;  %v656_v0 = vmov 0   ;;  %v657_v1 = vmov 2   ;;  %v554_v2 = vld [vmem:[%s878_s0] sm:$0xff]   ;;  %v658_v6 = vmov 1  }
   0x7   :  { %576 = vset.pattern.permute.xlu0 %v656_v0  ;;  %588 = vset.pattern.permute.xlu1 %v657_v1  ;;  %v555_v3 = vunpack.c.l.bf16 %v554_v2  ;;  %v556_v4 = vunpack.c.h.bf16 %v554_v2  ;;  %v659_v7 = vmov 3   ;;  %v552_v10 = vld [vmem:[#allocation2 + $0x38] sm:$0xff]  ;;  %v38_v11 = vld [vmem:[%s879_s1] sm:$0x3]  ;;  %v551_v12 = vld [vmem:[#allocation2 + $0x30] sm:$0xff]  ;;  %s666_s25 = smov [#allocation5]  }
   0x8   :  { %470 = vmatpush.bf16.msra.mxu0 %v552_v10  ;;  %v39_v13 = vunpack.c.l.bf16 %v38_v11  ;;  %v550_v14 = vld [vmem:[#allocation2 + $0x28] sm:$0xff]  ;;  %v549_v29 = vld [vmem:[#allocation2 + $0x20] sm:$0xff]  ;;  %v548_v40 = vld [vmem:[#allocation2 + $0x18] sm:$0xff]  ;;  %v661_v11 = vmov 2475754826   ;;  %s492_s26 = sshll.u32 %s666_s25, 4  ;;  %s493_s26 = int_to_ptr.vmem [resolvable:$true] %s492_s26 }
   0x9   :  { %v577_v5 = vpack.i.bf16 %v556_v4, %v555_v3  ;;  %v547_v45 = vld [vmem:[#allocation2 + $0x10] sm:$0xff]  ;;  %v546_v52 = vld [vmem:[#allocation2 + $0x8] sm:$0xff]  ;;  %v545_v60 = vld [vmem:[#allocation2] sm:$0xff]  ;;  %s494_s29 = sshll.u32 %s882_s4, 4  ;;  %s495_s29 = int_to_ptr.hbm [resolvable:$true] %s494_s29 }
   0xa   :  { %v50_v15 = vperm.slane %v39_v13, 0  ;;  %v61_v18 = vperm.slane %v39_v13, 1  ;;  %v74_v19 = vperm.slane %v39_v13, 2  ;;  %v87_v23 = vperm.slane %v39_v13, 3 }
   0xb   :  { %578 = vperm.xlu0 %576, %v577_v5   ;;  %590 = vperm.xlu1 %588, %v577_v5  }
   0xc   :  { %471 = vmatpush.bf16.msra.mxu0 %v551_v12 }
  0x10   :  { %472 = vmatpush.bf16.msra.mxu0 %v550_v14  ;;  %v662_v14 = vmov 2131351028  }
  0x13   :  { %582 = vset.pattern.permute.xlu0 %v658_v6  ;;  %594 = vset.pattern.permute.xlu1 %v659_v7 }
  0x14   :  { %584 = vperm.xlu0 %582, %v577_v5   ;;  %596 = vperm.xlu1 %594, %v577_v5  }
  0x15   :  { %473 = vmatpush.bf16.msra.mxu0 %v549_v29 }
  0x19   :  { %474 = vmatpush.bf16.msra.mxu0 %v548_v40 }
  0x1c   :  { %600 = vset.pattern.permute.xlu0 %v659_v7 }
  0x1d   :  { %475 = vmatpush.bf16.msra.mxu0 %v547_v45 }
  0x21   :  { %476 = vmatpush.bf16.msra.mxu0 %v546_v52 }
  0x25   :  { %477 = vmatpush.bf16.msra.mxu0 %v545_v60 }
  0x7d   :  { %v579_v8 = vpop.permute.xlu0 %578  ;;  %v591_v9 = vpop.permute.xlu1 %590 }
  0x7e   :  { %v581_v16 = vunpack.i.h.bf16 %v579_v8  ;;  %v580_v17 = vunpack.i.l.bf16 %v579_v8  ;;  %v593_v20 = vunpack.i.h.bf16 %v591_v9  ;;  %v592_v21 = vunpack.i.l.bf16 %v591_v9 }
  0x7f   :  { %v660_v9 = vmov 683565275  }
  0x80   :  { %v52_v30 = vmul.f32 %v581_v16, %v50_v15  ;;  %v51_v31 = vmul.f32 %v580_v17, %v50_v15  ;;  %v76_v34 = vmul.f32 %v593_v20, %v74_v19  ;;  %v75_v35 = vmul.f32 %v592_v21, %v74_v19 }
  0x81   :  { %v663_v17 = vmov 2102212464   ;;  %v664_v20 = vmov 920167782  }
  0x86   :  { %v585_v22 = vpop.permute.xlu0 %584  ;;  %v597_v24 = vpop.permute.xlu1 %596 }
  0x87   :  { %v587_v25 = vunpack.i.h.bf16 %v585_v22  ;;  %v586_v26 = vunpack.i.l.bf16 %v585_v22  ;;  %v599_v27 = vunpack.i.h.bf16 %v597_v24  ;;  %v598_v28 = vunpack.i.l.bf16 %v597_v24 }
  0x89   :  { %v63_v32 = vmul.f32 %v587_v25, %v61_v18  ;;  %v62_v33 = vmul.f32 %v586_v26, %v61_v18  ;;  %v89_v38 = vmul.f32 %v599_v27, %v87_v23  ;;  %v88_v39 = vmul.f32 %v598_v28, %v87_v23 }
  0x8a   :  { %v665_v23 = vmov 1326507024  }
  0x8b   :  { %v64_v36 = vadd.f32 %v62_v33, %v51_v31  ;;  %v65_v37 = vadd.f32 %v63_v32, %v52_v30 }
  0x8d   :  { %v77_v41 = vadd.f32 %v75_v35, %v64_v36  ;;  %v78_v42 = vadd.f32 %v76_v34, %v65_v37 }
  0x8f   :  { %v705_v43 = vadd.f32 %v88_v39, %v77_v41  ;;  %v707_v44 = vadd.f32 %v89_v38, %v78_v42 }
  0x91   :  { %v95_v46 = vand.u32 2139095040, %v705_v43  ;;  %v250_v47 = vand.u32 2139095040, %v707_v44  ;;  %v92_v48 = vand.u32 2147483647, %v705_v43  ;;  %v247_v49 = vand.u32 2147483647, %v707_v44 }
  0x93   :  { %v96_v50 = vshrl.u32 %v95_v46, 23  ;;  %v251_v51 = vshrl.u32 %v250_v47, 23  ;;  %v99_v53 = vand.u32 8388607, %v92_v48  ;;  %v254_v57 = vand.u32 8388607, %v247_v49 }
  0x95   :  { %v507_v54 = vadd.s32 4294967169, %v96_v50  ;;  %v510_v55 = vadd.s32 4294967169, %v251_v51  ;;  %v100_v56 = vor.u32 8388608, %v99_v53  ;;  %v255_v62 = vor.u32 8388608, %v254_v57 }
  0x97   :  { %v102_v58 = vadd.s32 1, %v507_v54  ;;  %v257_v59 = vadd.s32 1, %v510_v55  ;;  %v717_v61 = vshll.u32 %v100_v56, 8  ;;  %v722_v6 = vshll.u32 %v255_v62, 8 }
  0x99   :  { %vm103_vm0 = vcmp.gt.s32.totalorder %v102_v58, 0  ;;  %vm258_vm1 = vcmp.gt.s32.totalorder %v257_v59, 0  ;;  %v141_v5 = vand.u32 65535, %v717_v61  ;;  %v142_v28 = vshrl.u32 %v717_v61, 16 }
  0x9a   :  { %v104_v63 = vsel %vm103_vm0, %v102_v58, 0  ;;  %v259_v1 = vsel %vm258_vm1, %v257_v59, 0 }
  0x9b   :  { %v106_v2 = vand.u32 31, %v104_v63  ;;  %v719_v3 = vand.u32 31, %v259_v1  ;;  %v724_v7 = vshrl.u32 %v104_v63, 5  ;;  %v734_v29 = vshrl.u32 %v259_v1, 5 }
  0x9d   :  { %v107_v4 = vsub.s32 32, %v106_v2  ;;  %v727_v8 = vsub.s32 32, %v719_v3  ;;  %v109_v10 = vshll.u32 %v660_v9, %v106_v2  ;;  %v112_v12 = vshll.u32 %v661_v11, %v106_v2 }
  0x9e   :  { %v115_v16 = vshll.u32 %v662_v14, %v106_v2  ;;  %v118_v19 = vshll.u32 %v663_v17, %v106_v2  ;;  %v121_v22 = vshll.u32 %v664_v20, %v106_v2  ;;  %vm124_vm2 = vcmp.lt.s32.totalorder %v724_v7, 1 }
  0x9f   :  { %v110_v13 = vshrl.u32 %v661_v11, %v107_v4  ;;  %v113_v15 = vshrl.u32 %v662_v14, %v107_v4  ;;  %v116_v18 = vshrl.u32 %v663_v17, %v107_v4  ;;  %v119_v21 = vshrl.u32 %v664_v20, %v107_v4 }
  0xa0   :  { %v122_v24 = vshrl.u32 %v665_v23, %v107_v4  ;;  %v108_v32 = vshrl.u32 %v660_v9, %v107_v4  ;;  %vm127_vm3 = vcmp.lt.s32.totalorder %v724_v7, 4  ;;  %vm126_vm4 = vcmp.lt.s32.totalorder %v724_v7, 3 }
  0xa1   :  { %v111_v25 = vor.u32 %v110_v13, %v109_v10  ;;  %v114_v26 = vor.u32 %v113_v15, %v112_v12  ;;  %v117_v27 = vor.u32 %v116_v18, %v115_v16  ;;  %v120_v30 = vor.u32 %v119_v21, %v118_v19 }
  0xa2   :  { %v123_v31 = vor.u32 %v122_v24, %v121_v22  ;;  %v265_v37 = vshrl.u32 %v661_v11, %v727_v8  ;;  %vm125_vm5 = vcmp.lt.s32.totalorder %v724_v7, 2  ;;  %v264_v46 = vshll.u32 %v660_v9, %v719_v3 }
  0xa3   :  { %v132_v33 = vsel %vm124_vm2, %v111_v25, %v114_v26  ;;  %v136_v34 = vsel %vm124_vm2, %v114_v26, %v117_v27  ;;  %v133_v35 = vsel %vm127_vm3, %v120_v30, 920167782  ;;  %v129_v38 = vsel %vm127_vm3, %v117_v27, 2102212464 }
  0xa4   :  { %v137_v36 = vsel %vm127_vm3, %v123_v31, 1326507024  ;;  %v134_v39 = vsel %vm126_vm4, %v117_v27, %v133_v35  ;;  %v746_v41 = vsel %vm124_vm2, %v108_v32, %v111_v25  ;;  %v130_v53 = vsel %vm126_vm4, %v114_v26, %v129_v38 }
  0xa5   :  { %v138_v40 = vsel %vm126_vm4, %v120_v30, %v137_v36  ;;  %v135_v42 = vsel %vm125_vm5, %v132_v33, %v134_v39  ;;  %v756_v54 = vor.u32 %v265_v37, %v264_v46  ;;  %v267_v55 = vshll.u32 %v661_v11, %v719_v3 }
  0xa6   :  { %v139_v45 = vsel %vm125_vm5, %v136_v34, %v138_v40  ;;  %v165_v51 = vand.u32 65535, %v135_v42  ;;  %v166_v52 = vshrl.u32 %v135_v42, 16  ;;  %v268_v56 = vshrl.u32 %v662_v14, %v727_v8 }
  0xa7   :  { %v143_v47 = vand.u32 65535, %v139_v45  ;;  %v144_v50 = vshrl.u32 %v139_v45, 16  ;;  %v270_v59 = vshll.u32 %v662_v14, %v719_v3  ;;  %v271_v60 = vshrl.u32 %v663_v17, %v727_v8 }
  0xa8   :  { %v168_v63 = vmul.u32 %v166_v52, %v141_v5  ;;  %v169_v1 = vmul.u32 %v165_v51, %v142_v28  ;;  %v273_v2 = vshll.u32 %v663_v17, %v719_v3  ;;  %v167_v12 = vmul.u32 %v165_v51, %v141_v5 }
  0xa9   :  { %v146_v57 = vmul.u32 %v144_v50, %v141_v5  ;;  %v147_v58 = vmul.u32 %v143_v47, %v142_v28  ;;  %v145_v62 = vmul.u32 %v143_v47, %v141_v5  ;;  %v148_v4 = vmul.u32 %v144_v50, %v142_v28 }
  0xaa   :  { %v170_v13 = vmul.u32 %v166_v52, %v142_v28  ;;  %v171_v18 = vshll.u32 %v168_v63, 16  ;;  %v173_v21 = vshll.u32 %v169_v1, 16  ;;  %v763_v22 = vor.u32 %v268_v56, %v267_v55 }
  0xab   :  { %v149_v10 = vshll.u32 %v146_v57, 16  ;;  %v150_v15 = vshrl.u32 %v146_v57, 16  ;;  %v151_v16 = vshll.u32 %v147_v58, 16  ;;  %v152_v11 = vshrl.u32 %v147_v58, 16 }
  0xac   :  { %vm175_vm7 = vc.u32 %v167_v12, %v171_v18  ;;  %v177_v24 = vadd.s32 %v171_v18, %v167_v12  ;;  %v274_v17 = vshrl.u32 %v664_v20, %v727_v8  ;;  %v769_v26 = vor.u32 %v271_v60, %v270_v59 }
  0xad   :  { %vm153_vm6 = vc.u32 %v145_v62, %v149_v10  ;;  %v155_v19 = vadd.s32 %v149_v10, %v145_v62  ;;  %v176_v5 = vsel %vm175_vm7, 1, %v656_v0  ;;  %v276_v30 = vshll.u32 %v664_v20, %v719_v3 }
  0xae   :  { %v154_v14 = vsel %vm153_vm6, 1, %v656_v0  ;;  %v178_v28 = vadd.s32 %v176_v5, %v170_v13  ;;  %vm179_vm9 = vc.u32 %v177_v24, %v173_v21  ;;  %v275_v33 = vor.u32 %v274_v17, %v273_v2 }
  0xaf   :  { %v156_v25 = vadd.s32 %v154_v14, %v148_v4  ;;  %vm157_vm8 = vc.u32 %v155_v19, %v151_v16  ;;  %v180_v32 = vsel %vm179_vm9, 1, %v656_v0  ;;  %v277_v34 = vshrl.u32 %v665_v23, %v727_v8 }
  0xb0   :  { %v158_v27 = vsel %vm157_vm8, 1, %v656_v0  ;;  %v172_v35 = vshrl.u32 %v168_v63, 16  ;;  %v174_v36 = vshrl.u32 %v169_v1, 16  ;;  %v777_v37 = vadd.s32 %v177_v24, %v173_v21 }
  0xb1   :  { %v160_v31 = vadd.s32 %v158_v27, %v156_v25  ;;  %v182_v38 = vadd.s32 %v180_v32, %v178_v28  ;;  %v278_v40 = vor.u32 %v277_v34, %v276_v30  ;;  %vm279_vm10 = vcmp.lt.s32.totalorder %v734_v29, 1 }
  0xb2   :  { %vm282_vm11 = vcmp.lt.s32.totalorder %v734_v29, 4  ;;  %vm281_vm12 = vcmp.lt.s32.totalorder %v734_v29, 3  ;;  %v287_v3 = vsel %vm279_vm10, %v756_v54, %v763_v22  ;;  %vm280_vm13 = vcmp.lt.s32.totalorder %v734_v29, 2 }
  0xb3   :  { %v161_v39 = vadd.s32 %v160_v31, %v150_v15  ;;  %v183_v42 = vadd.s32 %v182_v38, %v172_v35  ;;  %v288_v20 = vsel %vm282_vm11, %v275_v33, 920167782  ;;  %v291_v46 = vsel %vm279_vm10, %v763_v22, %v769_v26 }
  0xb4   :  { %v289_v45 = vsel %vm281_vm12, %v769_v26, %v288_v20  ;;  %v131_v47 = vsel %vm125_vm5, %v746_v41, %v130_v53  ;;  %v292_v52 = vsel %vm282_vm11, %v278_v40, 1326507024  ;;  %v296_v56 = vand.u32 65535, %v722_v6 }
  0xb5   :  { %v788_v23 = vadd.s32 %v161_v39, %v152_v11  ;;  %v184_v50 = vadd.s32 %v183_v42, %v174_v36  ;;  %v290_v51 = vsel %vm280_vm13, %v287_v3, %v289_v45  ;;  %v293_v55 = vsel %vm281_vm12, %v275_v33, %v292_v52 }
  0xb6   :  { %v320_v57 = vand.u32 65535, %v290_v51  ;;  %v294_v7 = vsel %vm280_vm13, %v291_v46, %v293_v55  ;;  %v297_v41 = vshrl.u32 %v722_v6, 16  ;;  %v321_v53 = vshrl.u32 %v290_v51, 16 }
  0xb7   :  { %vm187_vm14 = vc.u32 %v788_v23, %v777_v37  ;;  %v188_v58 = vadd.s32 1, %v184_v50  ;;  %v185_v59 = vmul.u32 %v717_v61, %v131_v47  ;;  %v298_v60 = vand.u32 65535, %v294_v7 }
  0xb8   :  { %v299_v62 = vshrl.u32 %v294_v7, 16  ;;  %v323_v1 = vmul.u32 %v321_v53, %v296_v56  ;;  %v324_v2 = vmul.u32 %v320_v57, %v297_v41  ;;  %v322_v13 = vmul.u32 %v320_v57, %v296_v56 }
  0xb9   :  { %v189_v63 = vsel %vm187_vm14, %v188_v58, %v184_v50  ;;  %v302_v12 = vmul.u32 %v298_v60, %v297_v41  ;;  %v325_v15 = vmul.u32 %v321_v53, %v297_v41  ;;  %v300_v18 = vmul.u32 %v298_v60, %v296_v56 }
  0xba   :  { %v190_v4 = vadd.s32 %v189_v63, %v185_v59  ;;  %v301_v10 = vmul.u32 %v299_v62, %v296_v56  ;;  %v326_v16 = vshll.u32 %v323_v1, 16  ;;  %v303_v19 = vmul.u32 %v299_v62, %v297_v41 }
  0xbb   :  { %v306_v14 = vshll.u32 %v302_v12, 16  ;;  %v328_v24 = vshll.u32 %v324_v2, 16  ;;  %v284_v31 = vsel %vm282_vm11, %v769_v26, 2102212464  ;;  %v263_v33 = vshrl.u32 %v660_v9, %v727_v8 }
  0xbc   :  { %v191_v11 = vadd.s32 536870912, %v190_v4  ;;  %v304_v21 = vshll.u32 %v301_v10, 16  ;;  %vm330_vm15 = vc.u32 %v322_v13, %v326_v16  ;;  %v332_v17 = vadd.s32 %v326_v16, %v322_v13 }
  0xbd   :  { %v331_v5 = vsel %vm330_vm15, 1, %v656_v0  ;;  %v305_v38 = vshrl.u32 %v301_v10, 16  ;;  %v283_v42 = vsel %vm279_vm10, %v263_v33, %v756_v54  ;;  %v285_v26 = vsel %vm281_vm12, %v763_v22, %v284_v31 }
  0xbe   :  { %v814_v61 = vshrl.u32 %v191_v11, 30  ;;  %vm308_vm0 = vc.u32 %v300_v18, %v304_v21  ;;  %v310_v25 = vadd.s32 %v304_v21, %v300_v18  ;;  %v333_v28 = vadd.s32 %v331_v5, %v325_v15 }
  0xbf   :  { %v309_v27 = vsel %vm308_vm0, 1, %v656_v0  ;;  %vm334_vm1 = vc.u32 %v332_v17, %v328_v24  ;;  %v327_v3 = vshrl.u32 %v323_v1, 16  ;;  %v307_v8 = vshrl.u32 %v302_v12, 16 }
  0xc0   :  { %v193_v30 = vshll.u32 %v814_v61, 30  ;;  %v311_v32 = vadd.s32 %v309_v27, %v303_v19  ;;  %vm312_vm2 = vc.u32 %v310_v25, %v306_v14  ;;  %v335_v35 = vsel %vm334_vm1, 1, %v656_v0 }
  0xc1   :  { %v313_v34 = vsel %vm312_vm2, 1, %v656_v0  ;;  %v337_v40 = vadd.s32 %v335_v35, %v333_v28  ;;  %v329_v45 = vshrl.u32 %v324_v2, 16  ;;  %v286_v51 = vsel %vm280_vm13, %v283_v42, %v285_v26 }
  0xc2   :  { %v194_v36 = vsub.s32 %v190_v4, %v193_v30  ;;  %v315_v39 = vadd.s32 %v313_v34, %v311_v32  ;;  %v336_v52 = vadd.s32 %v332_v17, %v328_v24  ;;  %v340_v22 = vmul.u32 %v722_v6, %v286_v51 }
  0xc3   :  { %v338_v46 = vadd.s32 %v337_v40, %v327_v3  ;;  %v186_v41 = vadd.s32 %v777_v37, %v788_v23  ;;  %vm94_vm7 = vcmp.lt.s32.totalorder %v705_v43, 0  ;;  %vm840_vm8 = vcmp.le.f32.partialorder %v92_v48, 0.7853982 }
  0xc4   :  { %vm195_vm3 = vcmp.lt.s32.totalorder %v194_v36, 0  ;;  %v196_v20 = vsub.s32 0, %v194_v36  ;;  %v316_v9 = vadd.s32 %v315_v39, %v305_v38  ;;  %vm249_vm10 = vcmp.lt.s32.totalorder %v707_v44, 0 }
  0xc5   :  { %v339_v55 = vadd.s32 %v338_v46, %v329_v45  ;;  %vm856_vm11 = vcmp.le.f32.partialorder %v247_v49, 0.7853982  ;;  %vm235_vm15 = vweird.f32 %v705_v43 }
  0xc6   :  { %v197_v0 = vsel %vm195_vm3, %v196_v20, %v194_v36  ;;  %v317_v47 = vadd.s32 %v316_v9, %v307_v8  ;;  %v216_v20 = vsub.s32 4, %v814_v61  ;;  %vm390_vm3 = vweird.f32 %v707_v44 }
  0xc7   :  { %v198_v50 = vclz %v197_v0  ;;  %v343_v56 = vadd.s32 1, %v339_v55 }
  0xc8   :  { %vm342_vm4 = vc.u32 %v317_v47, %v336_v52  ;;  %v341_v27 = vadd.s32 %v336_v52, %v317_v47  ;;  %v217_v0 = vsel %vm94_vm7, %v216_v20, %v814_v61 }
  0xc9   :  { %v508_v54 = vadd.s32 4294967294, %v198_v50  ;;  %v344_v57 = vsel %vm342_vm4, %v343_v56, %v339_v55 }
  0xca   :  { %v345_v7 = vadd.s32 %v344_v57, %v340_v22 }
  0xcb   :  { %vm509_vm5 = vcmp.lt.s32.totalorder %v508_v54, 0 }
  0xcc   :  { %v201_v58 = vsel %vm509_vm5, 0, %v508_v54  ;;  %v346_v60 = vadd.s32 536870912, %v345_v7  ;;  %v219_v54 = vsel %vm840_vm8, 0, %v217_v0 }
  0xcd   :  { %v202_v53 = vsub.s32 32, %v201_v58  ;;  %v206_v59 = vsub.s32 4294967266, %v201_v58  ;;  %v203_v62 = vshll.u32 %v194_v36, %v201_v58 }
  0xce   :  { %v347_v1 = vshrl.u32 %v346_v60, 30 }
  0xcf   :  { %v204_v29 = vshrl.u32 %v186_v41, %v202_v53  ;;  %v207_v63 = vadd.s32 127, %v206_v59 }
  0xd0   :  { %v348_v10 = vshll.u32 %v347_v1, 30  ;;  %v371_v52 = vsub.s32 4, %v347_v1 }
  0xd1   :  { %v205_v2 = vor.u32 %v204_v29, %v203_v62  ;;  %v208_v4 = vshll.u32 %v207_v63, 23 }
  0xd2   :  { %v349_v13 = vsub.s32 %v345_v7, %v348_v10  ;;  %v236_v7 = vadd.s32 3, %v219_v54  ;;  %v372_v41 = vsel %vm249_vm10, %v371_v52, %v347_v1 }
  0xd3   :  { %v209_v12 = vor.u32 4788187, %v208_v4  ;;  %v212_v15 = vcvt.s32.f32 %v205_v2  ;;  %v374_v62 = vsel %vm856_vm11, 0, %v372_v41 }
  0xd4   :  { %vm350_vm6 = vcmp.lt.s32.totalorder %v349_v13, 0  ;;  %v351_v16 = vsub.s32 0, %v349_v13  ;;  %v237_v2 = vand.u32 3, %v236_v7 }
  0xd5   :  { %v210_v6 = vand.u32 2147483647, %v209_v12 }
  0xd6   :  { %v352_v18 = vsel %vm350_vm6, %v351_v16, %v349_v13  ;;  %vm239_vm12 = vcmp.eq.s32.totalorder %v237_v2, 0  ;;  %vm242_vm13 = vcmp.eq.s32.totalorder %v237_v2, 2  ;;  %vm238_vm14 = vcmp.lt.s32.totalorder %v237_v2, 2 }
  0xd7   :  { %v213_v11 = vmul.f32 %v212_v15, %v210_v6  ;;  %v353_v37 = vclz %v352_v18 }
  0xd9   :  { %v214_v19 = vxor.u32 2147483648, %v213_v11  ;;  %v511_v14 = vadd.s32 4294967294, %v353_v37 }
  0xdb   :  { %v215_v21 = vsel %vm94_vm7, %v214_v19, %v213_v11  ;;  %vm512_vm9 = vcmp.lt.s32.totalorder %v511_v14, 0 }
  0xdc   :  { %v218_v24 = vsel %vm840_vm8, %v705_v43, %v215_v21  ;;  %v356_v25 = vsel %vm512_vm9, 0, %v511_v14 }
  0xdd   :  { %v220_v17 = vmul.f32 %v218_v24, %v218_v24  ;;  %v357_v28 = vsub.s32 32, %v356_v25  ;;  %v361_v30 = vsub.s32 4294967266, %v356_v25  ;;  %v358_v33 = vshll.u32 %v349_v13, %v356_v25 }
  0xde   :  { %v391_v13 = vadd.s32 3, %v374_v62 }
  0xdf   :  { %v228_v5 = vmul.f32 -0.00019511016, %v220_v17  ;;  %v359_v48 = vshrl.u32 %v341_v27, %v357_v28  ;;  %v221_v32 = vmul.f32 -0.001358992, %v220_v17  ;;  %v362_v34 = vadd.s32 127, %v361_v30 }
  0xe0   :  { %v392_v19 = vand.u32 3, %v391_v13 }
  0xe1   :  { %v229_v31 = vadd.f32 0.008332121, %v228_v5  ;;  %v360_v36 = vor.u32 %v359_v48, %v358_v33  ;;  %v363_v38 = vshll.u32 %v362_v34, 23  ;;  %v222_v39 = vadd.f32 0.041655596, %v221_v32 }
  0xe2   :  { %vm394_vm0 = vcmp.eq.s32.totalorder %v392_v19, 0  ;;  %vm397_vm1 = vcmp.eq.s32.totalorder %v392_v19, 2  ;;  %vm393_vm2 = vcmp.lt.s32.totalorder %v392_v19, 2 }
  0xe3   :  { %v230_v35 = vmul.f32 %v229_v31, %v220_v17  ;;  %v364_v40 = vor.u32 4788187, %v363_v38  ;;  %v367_v3 = vcvt.s32.f32 %v360_v36  ;;  %v223_v8 = vmul.f32 %v222_v39, %v220_v17  ;;  %v419_v31 = vld [vmem:[%s881_s3] sm:$0x1] }
  0xe4   :  { %v420_v32 = vunpack.c.l.bf16 %v419_v31 }
  0xe5   :  { %v231_v42 = vadd.f32 -0.16666654, %v230_v35  ;;  %v365_v26 = vand.u32 2147483647, %v364_v40  ;;  %v224_v47 = vadd.f32 -0.4999988, %v223_v8 }
  0xe6   :  { %v421_v33 = vperm.slane %v420_v32, 0 }
  0xe7   :  { %v368_v9 = vmul.f32 %v367_v3, %v365_v26  ;;  %v232_v45 = vmul.f32 %v231_v42, %v220_v17  ;;  %v225_v22 = vmul.f32 %v224_v47, %v220_v17 }
  0xe9   :  { %v369_v46 = vxor.u32 2147483648, %v368_v9  ;;  %v233_v56 = vadd.f32 1.0, %v232_v45  ;;  %v226_v60 = vadd.f32 1.0, %v225_v22 }
  0xeb   :  { %v370_v51 = vsel %vm249_vm10, %v369_v46, %v368_v9  ;;  %v234_v49 = vmul.f32 %v233_v56, %v218_v24  ;;  %v243_v6 = vxor.u32 2147483648, %v226_v60 }
  0xec   :  { %v373_v55 = vsel %vm856_vm11, %v707_v44, %v370_v51 }
  0xed   :  { %v375_v61 = vmul.f32 %v373_v55, %v373_v55  ;;  %v240_v4 = vxor.u32 2147483648, %v234_v49  ;;  %v244_v37 = vsel %vm242_vm13, %v243_v6, %v234_v49 }
  0xef   :  { %v376_v57 = vmul.f32 -0.001358992, %v375_v61  ;;  %v383_v58 = vmul.f32 -0.00019511016, %v375_v61  ;;  %v241_v11 = vsel %vm239_vm12, %v226_v60, %v240_v4 }
  0xf0   :  { %v245_v14 = vsel %vm238_vm14, %v241_v11, %v244_v37 }
  0xf1   :  { %v377_v53 = vadd.f32 0.041655596, %v376_v57  ;;  %v384_v59 = vadd.f32 0.008332121, %v383_v58  ;;  %v246_v17 = vsel %vm235_vm15, nan, %v245_v14 }
  0xf3   :  { %v378_v29 = vmul.f32 %v377_v53, %v375_v61  ;;  %v385_v63 = vmul.f32 %v384_v59, %v375_v61 }
  0xf5   :  { %v379_v10 = vadd.f32 -0.4999988, %v378_v29  ;;  %v386_v12 = vadd.f32 -0.16666654, %v385_v63 }
  0xf7   :  { %v380_v15 = vmul.f32 %v379_v10, %v375_v61  ;;  %v387_v16 = vmul.f32 %v386_v12, %v375_v61 }
  0xf9   :  { %v381_v1 = vadd.f32 1.0, %v380_v15  ;;  %v388_v18 = vadd.f32 1.0, %v387_v16 }
  0xfb   :  { %v389_v23 = vmul.f32 %v388_v18, %v373_v55  ;;  %v398_v21 = vxor.u32 2147483648, %v381_v1 }
  0xfd   :  { %v395_v24 = vxor.u32 2147483648, %v389_v23  ;;  %v399_v5 = vsel %vm397_vm1, %v398_v21, %v389_v23 }
  0xff   :  { %v396_v25 = vsel %vm394_vm0, %v381_v1, %v395_v24 }
 0x100   :  { %v400_v27 = vsel %vm393_vm2, %v396_v25, %v399_v5 }
 0x101   :  { %v401_v28 = vsel %vm390_vm3, nan, %v400_v27 }
 0x102   :  { %v402_v30 = vpack.c.bf16 %v401_v28, %v246_v17 }
 0x104   :  { %478 = vmatmul.bf16.vlgmr.msra.gmra.mxu0 %v402_v30 }
 0x181   :  { %v479_v48 = vpop.f32.mrf.mxu0 }
 0x182   :  { %v480_v34 = vadd.f32 %v479_v48, %v421_v33 }
 0x189   :  { %v481_v43 = vpop.f32.mrf.mxu0 }
 0x18a   :  { %v482_v44 = vadd.f32 %v481_v43, %v421_v33 }
 0x18c   :  { %v560_v35 = vpack.c.bf16 %v482_v44, %v480_v34 }
 0x18e   :  { %561 = vst [vmem:[#allocation5] sm:$0xff] %v560_v35  }
 0x18f   :  { %500 = dma.vmem_to_hbm [thread:$0]  %s493_s26, 128, %s495_s29, [#allocation4], %s654_s20, %s654_s20, %s655_s21  }
 0x190   :  { %651 = dma.done.wait [#allocation4], 128  }
 0x191   :  { %652 = vsyncadd [#allocation4], 4294967168 }
 0x192   :  { %505 = vsyncpa [#allocation3], 1 }
 0x193   :  { %506 = vsyncpa [#allocation4], 1 }

</bundles_post_ra>
